<compile_context>
chip_gen: v6e
topology: v6e:2x2x1
jax: 0.10.0
libtpu: 0.0.40
codegen_flags: <defaults>
</compile_context>

<pallas_src>
import functools

import jax
import jax.numpy as jnp
from jax.experimental import pallas as pl
from jax.experimental.pallas import tpu as pltpu


KH = KW = 3      # 3x3 conv, stride 1, padding 1
LANE = 128
NB_MAX = 128     # images per grid step (sized for v5e's 16 MiB default scoped VMEM)


def _conv_matmul_kernel(p_ref, w_ref, o_ref):
    """One fused matmul per batch block.

    p_ref: [K+1, NB*HWp]  bf16 im2col patches (+ trailing ones row for the bias)
    w_ref: [Cout, K+1]    bf16 flattened conv weights (+ trailing bias column)
    o_ref: [Cout, NB*HWp] f32 lane-dense output (flattened-NCHW per block)
    """
    o_ref[...] = jnp.dot(w_ref[...], p_ref[...],
                         preferred_element_type=jnp.float32)


def _im2col_kfirst(x_nchw, n_pad, hw_pad):
    """[N, Cin, H, W] -> [KH*KW*Cin, n_pad, hw_pad] bf16 (zero padding, stride 1).

    K index ordering is (kh, kw, cin), matching the weight flattening below.
    """
    n, cin, h, w = x_nchw.shape
    xpad = jnp.pad(x_nchw, ((0, n_pad - n), (0, 0), (1, 1), (1, 1)))
    taps = []
    for dh in range(KH):
        for dw in range(KW):
            taps.append(xpad[:, :, dh:dh + h, dw:dw + w])      # [n_pad, Cin, H, W]
    p = jnp.stack(taps, axis=0)                                # [9, n_pad, Cin, H, W]
    p = p.transpose(0, 2, 1, 3, 4)                             # [9, Cin, n_pad, H, W]
    p = p.reshape(KH * KW * cin, n_pad, h * w)                 # [K, n_pad, HW]
    if hw_pad != h * w:
        p = jnp.pad(p, ((0, 0), (0, 0), (0, hw_pad - h * w)))
    return p.astype(jnp.bfloat16)


@jax.jit
def conv2d_3x3_pallas(x_nchw, weight, bias):
    """x_nchw: [N, Cin, H, W], weight: [Cout, Cin, 3, 3], bias: [Cout].

    Returns [N, Cout, H, W] (same semantics as nn.Conv2d(k=3, s=1, p=1), bf16 matmul
    with f32 accumulation).
    """
    n, cin, h, w = x_nchw.shape
    cout = weight.shape[0]
    k = KH * KW * cin
    hw = h * w
    hw_pad = LANE * pl.cdiv(hw, LANE)        # keep the output lane axis unmasked
    nb = min(NB_MAX, n)                      # images per grid step
    num_blocks = pl.cdiv(n, nb)
    n_pad = num_blocks * nb

    # Layout plumbing (plain JAX).  Patches emitted directly in [K, N*HW] order and
    # in bf16 to halve HBM traffic on the dominant stream.
    patches = _im2col_kfirst(x_nchw, n_pad, hw_pad).reshape(k, n_pad * hw_pad)
    # Fuse the bias into the matmul: ones row on patches + bias column on weights.
    patches = jnp.pad(patches, ((0, 1), (0, 0)), constant_values=1.0)   # [K+1, NpHWp]
    w_flat = jnp.transpose(weight, (0, 2, 3, 1)).reshape(cout, k)       # [Cout, K]
    w_aug = jnp.concatenate([w_flat, bias.reshape(cout, 1)],
                            axis=1).astype(jnp.bfloat16)                # [Cout, K+1]

    out_flat = pl.pallas_call(
        _conv_matmul_kernel,
        out_shape=jax.ShapeDtypeStruct((cout, n_pad * hw_pad), jnp.float32),
        grid=(num_blocks,),
        in_specs=[
            # patches: one [K+1, NB*HWp] slab per batch block (lane axis = NB*HWp)
            pl.BlockSpec((k + 1, nb * hw_pad), lambda b: (0, b)),
            # weights (+bias column): resident across all steps
            pl.BlockSpec((cout, k + 1), lambda b: (0, 0)),
        ],
        out_specs=pl.BlockSpec((cout, nb * hw_pad), lambda b: (0, b)),
        compiler_params=pltpu.CompilerParams(
            dimension_semantics=("parallel",),   # batch blocks shard across v7x TCs
        ),
    )(patches, w_aug)

    # Cheap wrapper-side layout: [Cout, N_pad*HWp] -> [N, Cout, H, W].
    out = out_flat.reshape(cout, n_pad, hw_pad)[:, :n, :hw]
    return jnp.transpose(out, (1, 0, 2)).reshape(n, cout, h, w)


class ModuleAttributeWrapperPallas:
    """JAX/Pallas analogue of ModuleAttributeWrapper: forwards to the wrapped module."""

    def __init__(self, module_fn, name, value):
        self.module = module_fn
        setattr(self, name, value)   # metadata only, not used in forward

    def __call__(self, x):
        return self.module(x)


def _reference_conv(x_nchw, weight, bias):
    out = jax.lax.conv_general_dilated(
        x_nchw, weight,
        window_strides=(1, 1), padding=((1, 1), (1, 1)),
        dimension_numbers=("NCHW", "OIHW", "NCHW"),
    )
    return out + bias.reshape(1, -1, 1, 1)


if __name__ == "__main__":
    key = jax.random.PRNGKey(0)
    k_x, k_w, k_b = jax.random.split(key, 3)

    N, CIN, H, W = 2, 4, 16, 16
    COUT = 8

    x = jax.random.normal(k_x, (N, CIN, H, W), dtype=jnp.float32)
    # Deterministic synthetic parameters (PyTorch-like uniform init bound).
    fan_in = CIN * KH * KW
    bound = 1.0 / (fan_in ** 0.5)
    weight = jax.random.uniform(k_w, (COUT, CIN, KH, KW),
                                minval=-bound, maxval=bound, dtype=jnp.float32)
    bias = jax.random.uniform(k_b, (COUT,), minval=-bound, maxval=bound,
                              dtype=jnp.float32)

    wrapped = ModuleAttributeWrapperPallas(
        functools.partial(conv2d_3x3_pallas, weight=weight, bias=bias),
        "output_dim", COUT,
    )

    out = wrapped(x)
    out = jax.block_until_ready(out)

    ref = _reference_conv(x, weight, bias)
    assert out.shape == (N, COUT, H, W)
    # bf16 operands / f32 accumulation -> loosened tolerance vs. the f32 reference.
    assert jnp.allclose(out, ref, atol=5e-2, rtol=5e-2)

    print("KERNEL_OK")
</pallas_src>

<mosaic_0001>
module attributes {stable_mosaic.version = 11 : i64} {
  func.func @_conv_matmul_kernel(%arg0: i32, %arg1: memref<37x512xbf16, #tpu.memory_space<vmem>>, %arg2: memref<8x37xbf16, #tpu.memory_space<vmem>>, %arg3: memref<8x512xf32, #tpu.memory_space<vmem>>) attributes {dimension_semantics = [#tpu.dimension_semantics<parallel>], iteration_bounds = array<i64: 1>, scalar_prefetch = 0 : i64, scratch_operands = 0 : i64, tpu.core_type = #tpu.core_type<tc>, window_params = [{transform_indices = @transform_0, window_bounds = array<i64: 37, 512>}, {pipeline_mode = #tpu.pipeline_mode<synchronous>, transform_indices = @transform_1, window_bounds = array<i64: 8, 37>}, {transform_indices = @transform_2, window_bounds = array<i64: 8, 512>}]} {
    %c0 = arith.constant 0 : index
    %c0_0 = arith.constant 0 : index
    %0 = vector.load %arg2[%c0, %c0_0] : memref<8x37xbf16, #tpu.memory_space<vmem>>, vector<8x37xbf16>
    %c0_1 = arith.constant 0 : index
    %c0_2 = arith.constant 0 : index
    %1 = vector.load %arg1[%c0_1, %c0_2] : memref<37x512xbf16, #tpu.memory_space<vmem>>, vector<37x512xbf16>
    %cst = arith.constant dense<0.000000e+00> : vector<8x512xf32>
    %2 = tpu.matmul %0, %1, %cst {dimension_numbers = #tpu.dot_dimension_numbers<[1], [0], [0], [1], [0, 0, 1, 1], [], []>} : vector<8x37xbf16>, vector<37x512xbf16>, vector<8x512xf32> -> vector<8x512xf32>
    %c0_3 = arith.constant 0 : index
    %c0_4 = arith.constant 0 : index
    %3 = vector.load %arg3[%c0_3, %c0_4] : memref<8x512xf32, #tpu.memory_space<vmem>>, vector<8x512xf32>
    tpu.vector_store %arg3[%c0_3, %c0_4], %2 {strides = array<i32>} : memref<8x512xf32, #tpu.memory_space<vmem>>, vector<8x512xf32>,
    return
  }
  func.func @transform_0(%arg0: i32) -> (i32, i32) {
    %c0_i32 = arith.constant 0 : i32
    %c0_i32_0 = arith.constant 0 : i32
    return %c0_i32, %arg0 : i32, i32
  }
  func.func @transform_1(%arg0: i32) -> (i32, i32) {
    %c0_i32 = arith.constant 0 : i32
    %c0_i32_0 = arith.constant 0 : i32
    %c0_i32_1 = arith.constant 0 : i32
    return %c0_i32, %c0_i32_0 : i32, i32
  }
  func.func @transform_2(%arg0: i32) -> (i32, i32) {
    %c0_i32 = arith.constant 0 : i32
    %c0_i32_0 = arith.constant 0 : i32
    return %c0_i32, %arg0 : i32, i32
  }
}

</mosaic_0001>

<bundles_post_ra>
// kernel: conv2d_3x3_pallas.1
= control target key start
LH: loop header
LB: loop body
LE: loop exit
PB: predicated region body
PF: predicated region fallthrough
CT: control target
= control target key end

     0   :  { %vm77_vm0 = vcmask 1041408   ;;  %vm78_vm1 = vcmask 1042432   ;;  %v215_v1 = vmov 65535   ;;  %v216_v4 = vmov 0   ;;  %s277_s0 = inlined_call_operand.vmem [shape: bf16[37,512], index: 0, kind: input, shape index: {}]   ;;  %s278_s1 = inlined_call_operand.vmem [shape: bf16[8,37], index: 1, kind: input, shape index: {}]   ;;  %s279_s2 = inlined_call_operand.vmem [shape: f32[8,512], index: 2, kind: output, shape index: {}]  }
   0x1   :  { %v21_v0 = vld [vmem:[%s277_s0 + $0x40] sm:$0x77]  ;;  %v79_v2 = vsel %vm77_vm0, 4294967295, %v215_v1  ;;  %v22_v3 = vld [vmem:[%s277_s0 + $0x48] sm:$0x77]  ;;  %125 = vmatprep.mubr.bf16.mxu0 %v216_v4  ;;  %166 = vmatprep.mubr.bf16.mxu1 %v216_v4  ;;  %vm73_vm2 = vcmask 302080  }
   0x2   :  { %v192_v5 = vcombine.high %v21_v0, %v21_v0  ;;  %v80_v6 = vsel %vm78_vm1, %v79_v2, 0  ;;  %v194_v7 = vcombine.high %v22_v3, %v22_v3  ;;  %v191_v8 = vcombine.low %v21_v0, %v21_v0  ;;  %v203_v10 = vld [vmem:[%s277_s0 + $0x24] ss:$16 sps:$4 sm:$0xff]   ;;  %v205_v14 = vld [vmem:[%s277_s0 + $0x2c] ss:$16 sps:$4 sm:$0xff]  }
   0x3   :  { %v193_v9 = vcombine.low %v22_v3, %v22_v3  ;;  %v207_v16 = vld [vmem:[%s277_s0 + $0x20] ss:$16 sps:$4 sm:$0xff]   ;;  %v208_v17 = vld [vmem:[%s277_s0 + $0x28] ss:$16 sps:$4 sm:$0xff]   ;;  %v209_v18 = vld [vmem:[%s277_s0 + $0x4] ss:$16 sps:$4 sm:$0xff]  }
   0x4   :  { %v85_v11 = vand.u32 %v192_v5, %v80_v6  ;;  %v91_v12 = vand.u32 %v194_v7, %v80_v6  ;;  %v82_v13 = vand.u32 %v191_v8, %v80_v6  ;;  %v211_v19 = vld [vmem:[%s277_s0 + $0xc] ss:$16 sps:$4 sm:$0xff]   ;;  %v213_v20 = vld [vmem:[%s277_s0] ss:$16 sps:$4 sm:$0xff]   ;;  %v214_v21 = vld [vmem:[%s277_s0 + $0x8] ss:$16 sps:$4 sm:$0xff]  }
   0x5   :  { %v88_v15 = vand.u32 %v193_v9, %v80_v6  ;;  %v12_v22 = vld [vmem:[%s278_s1] sm:$0xf] }
   0x6   :  { %103 = vmatprep.subr.bf16.mxu0 %v85_v11  ;;  %144 = vmatprep.subr.bf16.mxu1 %v91_v12 }
   0x7   :  { %104 = vmatpush1.bf16.msra.mxu0 %v82_v13  ;;  %145 = vmatpush1.bf16.msra.mxu1 %v88_v15 }
   0x8   :  { %105 = vmatprep.subr.bf16.mxu0 %v203_v10  ;;  %146 = vmatprep.subr.bf16.mxu1 %v205_v14 }
   0xb   :  { %106 = vmatpush1.bf16.msra.mxu0 %v207_v16  ;;  %147 = vmatpush1.bf16.msra.mxu1 %v208_v17 }
   0xc   :  { %107 = vmatprep.subr.bf16.mxu0 %v209_v18  ;;  %148 = vmatprep.subr.bf16.mxu1 %v211_v19 }
   0xf   :  { %108 = vmatpush1.bf16.msra.mxu0 %v213_v20  ;;  %149 = vmatpush1.bf16.msra.mxu1 %v214_v21 }
  0x12   :  { %195 = vmatmul.mubr.msk.bf16.vlgmr.msra.gmra.mxu0 %vm73_vm2, %v12_v22  ;;  %196 = vmatmul.mubr.msk.bf16.vlgmr.msra.gmra.mxu1 %vm73_vm2, %v12_v22 }
  0xd2   :  { %v127_v23 = vpop.f32.mrf.mxu0  ;;  %v168_v24 = vpop.f32.mrf.mxu1 }
  0xd3   :  { %175 = vst [vmem:[%s279_s2] sm:$0xff] %v127_v23  ;;  %177 = vst [vmem:[%s279_s2 + $0x10] sm:$0xff] %v168_v24 }
  0xd4   :  { %v129_v25 = vpop.f32.mrf.mxu0  ;;  %v170_v26 = vpop.f32.mrf.mxu1 }
  0xd5   :  { %176 = vst [vmem:[%s279_s2 + $0x8] sm:$0xff] %v129_v25  ;;  %178 = vst [vmem:[%s279_s2 + $0x18] sm:$0xff] %v170_v26 }
  0xd6   :  { %v131_v27 = vpop.f32.mrf.mxu0  ;;  %v172_v28 = vpop.f32.mrf.mxu1 }
  0xd8   :  { %v132_v29 = vpop.f32.mrf.mxu0  ;;  %v173_v30 = vpop.f32.mrf.mxu1 }

</bundles_post_ra>
